<compile_context>
chip_gen: v7x
topology: tpu7x:2x2x1
jax: 0.10.0
libtpu: 0.0.40
codegen_flags: <defaults>
</compile_context>

<pallas_src>
import jax
import jax.numpy as jnp
from jax.experimental import pallas as pl
from jax.experimental.pallas import tpu as pltpu


def _rmsnorm_kernel(x_ref, w_ref, b_ref, o_ref):
    """x_ref: (tile_rows, D); w_ref/b_ref: (1, D) f32; o_ref: (tile_rows, D)."""
    xf = x_ref[...].astype(jnp.float32)
    # Reference semantics: "rms" is the mean of squares — NO sqrt, no eps.
    rms = jnp.mean(xf * xf, axis=-1, keepdims=True)           # (tile_rows, 1) f32
    inv = pl.reciprocal(rms, approx=False)                    # exact x / rms
    # f32 tail everywhere; weight/bias already f32 (pre-cast in wrapper), so the
    # body re-emits no per-step casts. Single cast to the output dtype at store.
    out = xf * inv * w_ref[...] + b_ref[...]
    o_ref[...] = out.astype(o_ref.dtype)


def _sublane_multiple(dtype):
    """Native packed sublane multiple: 8 for f32, 16 for bf16, 32 for int8/fp8."""
    itemsize = jnp.dtype(dtype).itemsize
    return max(8, 32 // max(int(itemsize), 1))


def _pick_tile_rows(n_rows, d_model, dtype):
    itemsize = int(jnp.dtype(dtype).itemsize)
    sub = _sublane_multiple(dtype)

    # Generation-aware VMEM budget; fall back to the smallest (v7x: 64 MiB/core).
    try:
        vmem_cap = int(pltpu.get_tpu_info().vmem_capacity_bytes)
    except Exception:
        vmem_cap = 64 * 1024 * 1024
    block_budget = min(vmem_cap // 3, 48 * 1024 * 1024)

    # 2x input + 2x output pipeline buffers, plus f32 intermediates (xf, xf*xf)
    # materialized at block size when the input dtype is narrower than f32.
    per_row = 4 * d_model * itemsize
    if itemsize < 4:
        per_row += 2 * d_model * 4

    cap_rows = max(sub, block_budget // max(per_row, 1))
    # Target multi-MiB blocks so per-grid-step overhead is amortized; the cap on
    # rows scales up for small D instead of a fixed 1024-row ceiling.
    target_rows = max(1024, (4 * 1024 * 1024) // max(d_model * itemsize, 1))
    tile = min(cap_rows, target_rows, 8192)

    # Keep >= 4 grid steps when N allows (prefetch/writeback overlap and >=2
    # steps per v7x TensorCore).
    if n_rows >= 4 * sub:
        tile = min(tile, n_rows // 4)
    # Never exceed the rows we actually have (rounded to a sublane multiple).
    if n_rows >= sub:
        tile = min(tile, (n_rows // sub) * sub)

    tile = max(sub, (int(tile) // sub) * sub)
    return int(tile)


def rmsnorm(x, weight, bias, *, tile_rows=None):
    """x: (B, S, D); weight/bias: (1, 1, D) (as in the torch module)."""
    B, S, D = x.shape
    N = B * S
    # Note: D % 128 == 0 keeps output stores lane-dense; other D still works but
    # takes masked partial stores (measurably slower store path).
    xf = x.reshape(N, D)
    w2 = weight.reshape(1, D).astype(jnp.float32)   # cast once here, not per step
    b2 = bias.reshape(1, D).astype(jnp.float32)

    sub = _sublane_multiple(x.dtype)
    if tile_rows is None:
        tile_rows = _pick_tile_rows(N, D, x.dtype)
    tile_rows = max(sub, (int(tile_rows) // sub) * sub)

    grid = (pl.cdiv(N, tile_rows),)   # partial trailing block handled by Pallas

    # Scoped-VMEM limit from actual need (+ slack), capped well below v7x's
    # 64 MiB physical VMEM so the compiler keeps headroom for internal scratch.
    itemsize = int(jnp.dtype(x.dtype).itemsize)
    per_row = 4 * D * itemsize + (2 * D * 4 if itemsize < 4 else 0)
    vmem_need = per_row * tile_rows + 4 * D * 4 + (4 << 20)
    vmem_limit = int(min(max(vmem_need, 16 << 20), 48 << 20))

    out_flat = pl.pallas_call(
        _rmsnorm_kernel,
        out_shape=jax.ShapeDtypeStruct((N, D), x.dtype),
        grid_spec=pltpu.PrefetchScalarGridSpec(
            num_scalar_prefetch=0,
            grid=grid,
            in_specs=[
                pl.BlockSpec((tile_rows, D), lambda i: (i, 0)),
                pl.BlockSpec((1, D), lambda i: (0, 0)),
                pl.BlockSpec((1, D), lambda i: (0, 0)),
            ],
            out_specs=pl.BlockSpec((tile_rows, D), lambda i: (i, 0)),
        ),
        compiler_params=pltpu.CompilerParams(
            dimension_semantics=("parallel",),
            vmem_limit_bytes=vmem_limit,
        ),
    )(xf, w2, b2)

    return out_flat.reshape(B, S, D)


if __name__ == "__main__":
    # Small demo shape; D is a multiple of 128 so output stores are lane-dense.
    B, S, D = 2, 8, 128

    key = jax.random.PRNGKey(0)
    kx, kw, kb = jax.random.split(key, 3)
    x = jax.random.normal(kx, (B, S, D), dtype=jnp.float32)

    # Torch init is weight=ones(1,1,D), bias=zeros(1,1,D); perturb them slightly
    # (deterministically) so the affine path is actually exercised by the check.
    weight = jnp.ones((1, 1, D), jnp.float32) \
        + 0.1 * jax.random.normal(kw, (1, 1, D), dtype=jnp.float32)
    bias = 0.1 * jax.random.normal(kb, (1, 1, D), dtype=jnp.float32)

    out = rmsnorm(x, weight, bias)
    out = jax.block_until_ready(out)

    # Pure-JAX reference check (same semantics as the torch forward: no sqrt,
    # no eps).
    rms_ref = jnp.mean(x * x, axis=-1, keepdims=True)
    ref = x / rms_ref * weight + bias
    assert out.shape == ref.shape
    assert jnp.allclose(out, ref, atol=1e-5, rtol=1e-5), "mismatch vs reference"

    print("KERNEL_OK")
</pallas_src>

<mosaic_0001>
module attributes {stable_mosaic.version = 11 : i64} {
  func.func @_rmsnorm_kernel(%arg0: i32, %arg1: memref<16x128xf32, #tpu.memory_space<vmem>>, %arg2: memref<1x128xf32, #tpu.memory_space<vmem>>, %arg3: memref<1x128xf32, #tpu.memory_space<vmem>>, %arg4: memref<16x128xf32, #tpu.memory_space<vmem>>) attributes {dimension_semantics = [#tpu.dimension_semantics<parallel>], iteration_bounds = array<i64: 1>, scalar_prefetch = 0 : i64, scratch_operands = 0 : i64, tpu.core_type = #tpu.core_type<tc>, window_params = [{transform_indices = @transform_0, window_bounds = array<i64: 16, 128>}, {pipeline_mode = #tpu.pipeline_mode<synchronous>, transform_indices = @transform_1, window_bounds = array<i64: 1, 128>}, {pipeline_mode = #tpu.pipeline_mode<synchronous>, transform_indices = @transform_2, window_bounds = array<i64: 1, 128>}, {transform_indices = @transform_3, window_bounds = array<i64: 16, 128>}]} {
    %c0 = arith.constant 0 : index
    %c0_0 = arith.constant 0 : index
    %0 = vector.load %arg1[%c0, %c0_0] : memref<16x128xf32, #tpu.memory_space<vmem>>, vector<16x128xf32>
    %1 = arith.mulf %0, %0 : vector<16x128xf32>
    %cst = arith.constant dense<0.000000e+00> : vector<16xf32>
    %2 = vector.multi_reduction <add>, %1, %cst [1] : vector<16x128xf32> to vector<16xf32>
    %3 = vector.shape_cast %2 : vector<16xf32> to vector<16x1xf32>
    %cst_1 = arith.constant 1.280000e+02 : f32
    %4 = vector.broadcast %cst_1 : f32 to vector<16x1xf32>
    %5 = arith.divf %3, %4 : vector<16x1xf32>
    %6 = tpu.reciprocal %5 : vector<16x1xf32> -> vector<16x1xf32>
    %7 = vector.broadcast %6 : vector<16x1xf32> to vector<16x128xf32>
    %8 = arith.mulf %0, %7 : vector<16x128xf32>
    %c0_2 = arith.constant 0 : index
    %c0_3 = arith.constant 0 : index
    %9 = vector.load %arg2[%c0_2, %c0_3] : memref<1x128xf32, #tpu.memory_space<vmem>>, vector<1x128xf32>
    %10 = vector.broadcast %9 : vector<1x128xf32> to vector<16x128xf32>
    %11 = arith.mulf %8, %10 : vector<16x128xf32>
    %c0_4 = arith.constant 0 : index
    %c0_5 = arith.constant 0 : index
    %12 = vector.load %arg3[%c0_4, %c0_5] : memref<1x128xf32, #tpu.memory_space<vmem>>, vector<1x128xf32>
    %13 = vector.broadcast %12 : vector<1x128xf32> to vector<16x128xf32>
    %14 = arith.addf %11, %13 : vector<16x128xf32>
    %c0_6 = arith.constant 0 : index
    %c0_7 = arith.constant 0 : index
    %15 = vector.load %arg4[%c0_6, %c0_7] : memref<16x128xf32, #tpu.memory_space<vmem>>, vector<16x128xf32>
    tpu.vector_store %arg4[%c0_6, %c0_7], %14 {strides = array<i32>} : memref<16x128xf32, #tpu.memory_space<vmem>>, vector<16x128xf32>,
    return
  }
  func.func @transform_0(%arg0: i32) -> (i32, i32) {
    %c0_i32 = arith.constant 0 : i32
    %c0_i32_0 = arith.constant 0 : i32
    return %arg0, %c0_i32 : i32, i32
  }
  func.func @transform_1(%arg0: i32) -> (i32, i32) {
    %c0_i32 = arith.constant 0 : i32
    %c0_i32_0 = arith.constant 0 : i32
    %c0_i32_1 = arith.constant 0 : i32
    return %c0_i32, %c0_i32_0 : i32, i32
  }
  func.func @transform_2(%arg0: i32) -> (i32, i32) {
    %c0_i32 = arith.constant 0 : i32
    %c0_i32_0 = arith.constant 0 : i32
    %c0_i32_1 = arith.constant 0 : i32
    return %c0_i32, %c0_i32_0 : i32, i32
  }
  func.func @transform_3(%arg0: i32) -> (i32, i32) {
    %c0_i32 = arith.constant 0 : i32
    %c0_i32_0 = arith.constant 0 : i32
    return %arg0, %c0_i32 : i32, i32
  }
}

</mosaic_0001>

<bundles_post_ra>
// kernel: tpu_custom_call.1
= control target key start
LH: loop header
LB: loop body
LE: loop exit
PB: predicated region body
PF: predicated region fallthrough
CT: control target
= control target key end

     0   :  { %8 = vsyncpa [#allocation3], 0  ;;  %s199_s0 = inlined_call_operand.hbm [shape: f32[16,128], index: 0, kind: input, shape index: {}]   ;;  %s200_s1 = inlined_call_operand.vmem [shape: f32[1,128], index: 1, kind: input, shape index: {}]   ;;  %s201_s2 = inlined_call_operand.vmem [shape: f32[1,128], index: 2, kind: input, shape index: {}]   ;;  %s202_s3 = inlined_call_operand.hbm [shape: f32[16,128], index: 3, kind: output, shape index: {}]  }
   0x1   :  { %9 = vsyncpa [#allocation4], 0  ;;  %s139_s12 = smov [#allocation2]   ;;  %s91_s16 = scalar_lea.hbm %s199_s0, 256 }
   0x2   :  { %s15_s13 = sshll.u32 %s139_s12, 4  ;;  %p92_p0 = scmp.ne.s32.totalorder %s199_s0, %s91_s16  ;;  %s16_s13 = int_to_ptr.vmem [resolvable:$true] %s15_s13 }
   0x3   :  { %p95_p1 = scmp.lt.u32.totalorder %s91_s16, %s199_s0 }
   0x5   :  { %p97_p2 = pnand %p95_p1, %p92_p0 }
   0x7   :  { %100 = shalt.err (!%p97_p2)
}
   0x8   :  { %s101_s21 = scalar_lea.vmem %s16_s13, 256  ;;  %p106_p4 = scmp.lt.s32.totalorder %s16_s13, %s16_s13 }
   0x9   :  { %p102_p3 = scmp.ne.s32.totalorder %s16_s13, %s101_s21  ;;  %p107_p5 = scmp.lt.s32.totalorder %s101_s21, %s101_s21 }
   0xb   :  { %p108_p6 = por %p107_p5, %p106_p4 }
   0xd   :  { %p109_p7 = pnand %p108_p6, %p102_p3 }
   0xf   :  { %112 = shalt.err (!%p109_p7)
}
  0x10   :  { %s140_s22 = smov 128   ;;  %s141_s23 = smov 8  }
  0x11   :  { %21 = dma.hbm_to_vmem [thread:$0]  %s199_s0, 256, %s16_s13, [#allocation3], %s140_s22, %s140_s22, %s141_s23  }
  0x12   :  { %135 = dma.done.wait [#allocation3], 256  }
  0x13   :  { %136 = vsyncadd [#allocation3], 4294967040  ;;  %v29_v0 = vld [vmem:[#allocation2] sm:$0xff]  ;;  %v30_v1 = vld [vmem:[#allocation2 + $0x8] sm:$0xff]  ;;  %s142_s29 = smov [#allocation5]  }
  0x14   :  { %v31_v2 = vmul.f32 %v29_v0, %v29_v0  ;;  %v32_v3 = vmul.f32 %v30_v1, %v30_v1  ;;  %v81_v9 = vld [vmem:[%s200_s1] ss:$0 sm:$0xff]  ;;  %s69_s30 = sshll.u32 %s142_s29, 4  ;;  %s70_s30 = int_to_ptr.vmem [resolvable:$true] %s69_s30 }
  0x15   :  { %v82_v11 = vld [vmem:[%s201_s2] ss:$0 sm:$0xff]  ;;  %s113_s4 = scalar_lea.vmem %s70_s30, 256  ;;  %p118_p9 = scmp.lt.s32.totalorder %s70_s30, %s70_s30 }
  0x16   :  { %33 = vadd.xlane.f32.xlu0 %v31_v2  ;;  %p114_p8 = scmp.ne.s32.totalorder %s70_s30, %s113_s4  ;;  %p119_p10 = scmp.lt.s32.totalorder %s113_s4, %s113_s4 }
  0x18   :  { %p120_p11 = por %p119_p10, %p118_p9 }
  0x1a   :  { %35 = vadd.xlane.f32.xlu0 %v32_v3  ;;  %p121_p12 = pnand %p120_p11, %p114_p8 }
  0xa3   :  { %v34_v4 = vpop.xlane.xlu0 %33 }
  0xa4   :  { %v38_v5 = vmul.f32 0.0078125, %v34_v4 }
  0xa6   :  { %87 = vrcp.f32 %v38_v5 }
  0xa7   :  { %v36_v6 = vpop.xlane.xlu0 %35 }
  0xa8   :  { %v39_v7 = vmul.f32 0.0078125, %v36_v6 }
  0xaa   :  { %89 = vrcp.f32 %v39_v7 }
  0xb0   :  { %v88_v8 = vpop.eup %87 }
  0xb1   :  { %v42_v10 = vmul.f32 %v88_v8, %v29_v0 }
  0xb3   :  { %v51_v12 = vmul.f32 %v81_v9, %v42_v10 }
  0xb4   :  { %v90_v13 = vpop.eup %89 }
  0xb5   :  { %v43_v14 = vmul.f32 %v90_v13, %v30_v1  ;;  %v60_v15 = vadd.f32 %v82_v11, %v51_v12 }
  0xb7   :  { %v52_v16 = vmul.f32 %v81_v9, %v43_v14  ;;  %62 = vst [vmem:[#allocation5] sm:$0xff] %v60_v15 }
  0xb9   :  { %v61_v17 = vadd.f32 %v82_v11, %v52_v16 }
  0xbb   :  { %63 = vst [vmem:[#allocation5 + $0x8] sm:$0xff] %v61_v17 }
  0xbc   :  { %124 = shalt.err (!%p121_p12)
}
  0xbd   :  { %s125_s5 = scalar_lea.hbm %s202_s3, 256 }
  0xbe   :  { %p126_p13 = scmp.ne.s32.totalorder %s202_s3, %s125_s5  ;;  %p129_p0 = scmp.lt.u32.totalorder %s125_s5, %s202_s3 }
  0xc0   :  { %p131_p1 = pnand %p129_p0, %p126_p13 }
  0xc2   :  { %134 = shalt.err (!%p131_p1)
}
  0xc3   :  { %75 = dma.vmem_to_hbm [thread:$0]  %s70_s30, 256, %s202_s3, [#allocation4], %s140_s22, %s140_s22, %s141_s23  }
  0xc4   :  { %137 = dma.done.wait [#allocation4], 256  }
  0xc5   :  { %138 = vsyncadd [#allocation4], 4294967040 }
  0xc6   :  { %79 = vsyncpa [#allocation3], 1 }
  0xc7   :  { %80 = vsyncpa [#allocation4], 1 }

</bundles_post_ra>
